<compile_context>
chip_gen: v6e
topology: v6e:2x2x1
jax: 0.10.0
libtpu: 0.0.40
codegen_flags: <defaults>
</compile_context>

<pallas_src>
import functools
import jax
import jax.numpy as jnp
from jax import lax
from jax.experimental import pallas as pl
from jax.experimental.pallas import tpu as pltpu

ACT_DTYPE = jnp.bfloat16          # inter-kernel activation dtype
LN_EPS = 1e-12
VMEM_LIMIT = 64 * 1024 * 1024     # explicit scoped-VMEM budget (fits v7x)


def _choose_tm(m):
    """Largest row tile dividing M, capped at M//2 so grids have >=2 steps."""
    limit = m // 2 if m >= 32 else m
    for tm in (512, 256, 128, 64, 32, 16, 8):
        if tm <= limit and m % tm == 0:
            return tm
    return m


# ----------------------------- in-kernel helpers ----------------------------

def _gelu(y):
    # TODO(synk): HF DistilBERT uses exact erf-GELU; tanh approximation used
    # here for guaranteed Mosaic lowering (|diff| < 1e-3 per activation).
    c = jnp.float32(0.7978845608028654)  # sqrt(2/pi)
    return 0.5 * y * (1.0 + jnp.tanh(c * (y + 0.044715 * y * y * y)))


def _layernorm(y, g, b):
    mu = jnp.mean(y, axis=-1, keepdims=True)
    var = jnp.mean((y - mu) * (y - mu), axis=-1, keepdims=True)
    return (y - mu) * lax.rsqrt(var + jnp.float32(LN_EPS)) * g + b


# ------------------------------- Pallas kernels ------------------------------

def _ln_kernel(x_ref, g_ref, b_ref, o_ref):
    x = x_ref[...].astype(jnp.float32)
    o_ref[...] = _layernorm(x, g_ref[...], b_ref[...]).astype(o_ref.dtype)


def layernorm(x, gamma, beta, out_dtype=ACT_DTYPE):
    M, H = x.shape
    tm = _choose_tm(M)
    const = lambda s: pl.BlockSpec(s, lambda i: (0, 0),
                                   pipeline_mode=pl.Buffered(1))
    return pl.pallas_call(
        _ln_kernel,
        out_shape=jax.ShapeDtypeStruct((M, H), out_dtype),
        grid=(M // tm,),
        in_specs=[
            pl.BlockSpec((tm, H), lambda i: (i, 0)),
            const((1, H)),
            const((1, H)),
        ],
        out_specs=pl.BlockSpec((tm, H), lambda i: (i, 0)),
        compiler_params=pltpu.CompilerParams(
            dimension_semantics=("parallel",),
            vmem_limit_bytes=VMEM_LIMIT),
    )(x, gamma, beta)


def _layer_body(x_ref, m_ref, wqkv_ref, bqkv_ref, wo_ref, bo_ref,
                sg_ref, sb_ref, w1_ref, b1_ref, w2_ref, b2_ref,
                og_ref, ob_ref, *, n_heads, head_dim, scale):
    """Fused transformer layer: MHSA + residual + LN + FFN + residual + LN."""
    S, H = x_ref.shape
    x_bf = x_ref[...]                                  # (S, H) bf16 (MXU operand)
    x_f32 = x_bf.astype(jnp.float32)

    # Fused QKV projection: bf16 x bf16 -> f32 accumulation.
    qkv = jnp.dot(x_bf, wqkv_ref[...],
                  preferred_element_type=jnp.float32) + bqkv_ref[...]   # (S, 3H)
    q = qkv[:, 0:H].astype(jnp.bfloat16)
    k = qkv[:, H:2 * H].astype(jnp.bfloat16)
    v = qkv[:, 2 * H:3 * H].astype(jnp.bfloat16)

    # Additive mask bias (pre-baked in glue): (1, S) f32, broadcast over heads.
    bias = m_ref[0][:, :S]

    # True per-head (S, d_head) contractions — no full-width zero-mask trick.
    ctx_heads = []
    for h in range(n_heads):
        lo = h * head_dim
        q_h = q[:, lo:lo + head_dim]
        k_h = k[:, lo:lo + head_dim]
        v_h = v[:, lo:lo + head_dim]
        s = lax.dot_general(q_h, k_h, (((1,), (1,)), ((), ())),
                            preferred_element_type=jnp.float32) * scale
        s = s + bias
        s = s - jnp.max(s, axis=-1, keepdims=True)
        p = jnp.exp(s)
        # approx reciprocal (EUP slot); use exact divide for strict parity tests.
        p = p * pl.reciprocal(jnp.sum(p, axis=-1, keepdims=True), approx=True)
        ctx_heads.append(jnp.dot(p.astype(jnp.bfloat16), v_h,
                                 preferred_element_type=jnp.float32))
    ctx = jnp.concatenate(ctx_heads, axis=-1)          # (S, H) f32

    # Output projection + residual + LayerNorm.
    y = x_f32 + jnp.dot(ctx.astype(jnp.bfloat16), wo_ref[...],
                        preferred_element_type=jnp.float32) + bo_ref[...]
    y = _layernorm(y, sg_ref[...], sb_ref[...])

    # FFN: lin1 + GELU + lin2 + residual + LayerNorm.
    hdn = jnp.dot(y.astype(jnp.bfloat16), w1_ref[...],
                  preferred_element_type=jnp.float32) + b1_ref[...]
    hdn = _gelu(hdn)
    z = y + jnp.dot(hdn.astype(jnp.bfloat16), w2_ref[...],
                    preferred_element_type=jnp.float32) + b2_ref[...]
    return _layernorm(z, og_ref[...], ob_ref[...])


def _layer_kernel(x_ref, m_ref, wqkv_ref, bqkv_ref, wo_ref, bo_ref,
                  sg_ref, sb_ref, w1_ref, b1_ref, w2_ref, b2_ref,
                  og_ref, ob_ref, o_ref, *, n_heads, head_dim, scale):
    out = _layer_body(x_ref, m_ref, wqkv_ref, bqkv_ref, wo_ref, bo_ref,
                      sg_ref, sb_ref, w1_ref, b1_ref, w2_ref, b2_ref,
                      og_ref, ob_ref, n_heads=n_heads, head_dim=head_dim,
                      scale=scale)
    o_ref[...] = out.astype(o_ref.dtype)


def _layer_cls_kernel(x_ref, m_ref, wqkv_ref, bqkv_ref, wo_ref, bo_ref,
                      sg_ref, sb_ref, w1_ref, b1_ref, w2_ref, b2_ref,
                      og_ref, ob_ref, wc_ref, bc_ref, o_ref, logits_ref,
                      *, n_heads, head_dim, scale):
    out = _layer_body(x_ref, m_ref, wqkv_ref, bqkv_ref, wo_ref, bo_ref,
                      sg_ref, sb_ref, w1_ref, b1_ref, w2_ref, b2_ref,
                      og_ref, ob_ref, n_heads=n_heads, head_dim=head_dim,
                      scale=scale)
    o_ref[...] = out.astype(o_ref.dtype)
    # Classifier fused into the last layer's epilogue (lane-dense padded N).
    logits = jnp.dot(out.astype(jnp.bfloat16), wc_ref[...],
                     preferred_element_type=jnp.float32) + bc_ref[...]
    logits_ref[...] = logits.astype(logits_ref.dtype)


def transformer_layer(x2d, mask_bias, lp, n_heads, seq_len,
                      cls_w=None, cls_b=None):
    M, H = x2d.shape
    B = M // seq_len
    F = lp["ff1_w"].shape[1]
    S_pad = mask_bias.shape[-1]
    head_dim = H // n_heads
    scale = 1.0 / float(head_dim) ** 0.5

    def const(shape):
        nd = len(shape)
        # Constant-index weights: single-buffered (nothing to prefetch).
        return pl.BlockSpec(shape, lambda b: (0,) * nd,
                            pipeline_mode=pl.Buffered(1))

    in_specs = [
        pl.BlockSpec((seq_len, H), lambda b: (b, 0)),          # tokens of batch b
        pl.BlockSpec((1, 1, S_pad), lambda b: (b, 0, 0)),      # additive mask bias
        const((H, 3 * H)), const((1, 3 * H)),                  # qkv
        const((H, H)), const((1, H)),                          # out proj
        const((1, H)), const((1, H)),                          # sa LN
        const((H, F)), const((1, F)),                          # ff1
        const((F, H)), const((1, H)),                          # ff2
        const((1, H)), const((1, H)),                          # out LN
    ]
    args = [x2d, mask_bias,
            lp["qkv_w"], lp["qkv_b"], lp["o_w"], lp["o_b"],
            lp["sa_ln_g"], lp["sa_ln_b"], lp["ff1_w"], lp["ff1_b"],
            lp["ff2_w"], lp["ff2_b"], lp["out_ln_g"], lp["out_ln_b"]]

    cparams = pltpu.CompilerParams(dimension_semantics=("parallel",),
                                   vmem_limit_bytes=VMEM_LIMIT)

    if cls_w is None:
        kernel = functools.partial(_layer_kernel, n_heads=n_heads,
                                   head_dim=head_dim, scale=scale)
        return pl.pallas_call(
            kernel,
            out_shape=jax.ShapeDtypeStruct((M, H), ACT_DTYPE),
            grid=(B,),
            in_specs=in_specs,
            out_specs=pl.BlockSpec((seq_len, H), lambda b: (b, 0)),
            compiler_params=cparams,
        )(*args)

    Npad = cls_w.shape[1]
    kernel = functools.partial(_layer_cls_kernel, n_heads=n_heads,
                               head_dim=head_dim, scale=scale)
    return pl.pallas_call(
        kernel,
        out_shape=(jax.ShapeDtypeStruct((M, H), ACT_DTYPE),
                   jax.ShapeDtypeStruct((M, Npad), ACT_DTYPE)),
        grid=(B,),
        in_specs=in_specs + [const((H, Npad)), const((1, Npad))],
        out_specs=(pl.BlockSpec((seq_len, H), lambda b: (b, 0)),
                   pl.BlockSpec((seq_len, Npad), lambda b: (b, 0))),
        compiler_params=cparams,
    )(*(args + [cls_w, cls_b]))


# ------------------------------- Model (glue) --------------------------------

def init_params(key, vocab, max_pos, H, ffn, n_layers, n_labels):
    keys = iter(jax.random.split(key, 16 * n_layers + 8))

    def w(shape, scale=0.02, dtype=jnp.float32):
        return (scale * jax.random.normal(next(keys), shape)).astype(dtype)

    zeros = lambda s: jnp.zeros(s, jnp.float32)
    ones = lambda s: jnp.ones(s, jnp.float32)

    n_pad = ((n_labels + 127) // 128) * 128
    cls_w = w((H, n_labels))
    params = {
        "word_emb": w((vocab, H)),
        "pos_emb": w((max_pos, H)),
        "emb_ln_g": ones((1, H)),
        "emb_ln_b": zeros((1, H)),
        # classifier weight zero-padded to a 128-lane multiple, stored bf16
        "cls_w_pad": jnp.pad(cls_w, ((0, 0), (0, n_pad - n_labels))
                             ).astype(jnp.bfloat16),
        "cls_b_pad": zeros((1, n_pad)),
        "num_labels": n_labels,
        "layers": [],
    }
    for _ in range(n_layers):
        qw, kw, vw = w((H, H)), w((H, H)), w((H, H))
        params["layers"].append({
            # fused QKV weight [H, 3H] = [q | k | v], bf16 for the MXU
            "qkv_w": jnp.concatenate([qw, kw, vw], axis=1).astype(jnp.bfloat16),
            "qkv_b": zeros((1, 3 * H)),
            "o_w": w((H, H), dtype=jnp.bfloat16), "o_b": zeros((1, H)),
            "sa_ln_g": ones((1, H)), "sa_ln_b": zeros((1, H)),
            "ff1_w": w((H, ffn), dtype=jnp.bfloat16), "ff1_b": zeros((1, ffn)),
            "ff2_w": w((ffn, H), dtype=jnp.bfloat16), "ff2_b": zeros((1, H)),
            "out_ln_g": ones((1, H)), "out_ln_b": zeros((1, H)),
        })
    return params


def distilbert_ner_forward(params, input_ids, attention_mask, n_heads,
                           labels=None):
    B, S = input_ids.shape
    H = params["word_emb"].shape[1]
    n_labels = params["num_labels"]

    # Embeddings (gather is glue), then Pallas LayerNorm.
    x = jnp.take(params["word_emb"], input_ids, axis=0)              # [B, S, H]
    x = x + params["pos_emb"][:S][None, :, :]
    x2d = layernorm(x.reshape(B * S, H).astype(jnp.float32),
                    params["emb_ln_g"], params["emb_ln_b"])          # bf16 [B*S,H]

    # Additive attention bias, lane-padded to a multiple of 128 (lane-dense).
    S_pad = ((S + 127) // 128) * 128
    bias = (1.0 - attention_mask.astype(jnp.float32)) * jnp.float32(-1e9)
    bias = jnp.pad(bias, ((0, 0), (0, S_pad - S)))[:, None, :]       # [B, 1, S_pad]

    logits_pad = None
    n_layers = len(params["layers"])
    for i, lp in enumerate(params["layers"]):
        if i == n_layers - 1:
            x2d, logits_pad = transformer_layer(
                x2d, bias, lp, n_heads, S,
                cls_w=params["cls_w_pad"], cls_b=params["cls_b_pad"])
        else:
            x2d = transformer_layer(x2d, bias, lp, n_heads, S)

    logits2d = logits_pad[:, :n_labels].astype(jnp.float32)
    logits = logits2d.reshape(B, S, n_labels)

    if labels is None:
        return logits

    # labels path (glue): token-level cross entropy, ignore_index = -100.
    logp = jax.nn.log_softmax(logits2d, axis=-1)
    flat_labels = labels.reshape(-1)
    valid = flat_labels != -100
    safe = jnp.where(valid, flat_labels, 0)
    nll = -jnp.take_along_axis(logp, safe[:, None], axis=-1)[:, 0]
    loss = jnp.sum(jnp.where(valid, nll, 0.0)) / jnp.maximum(jnp.sum(valid), 1)
    return loss, logits


# ----------------------------------- main ------------------------------------

if __name__ == "__main__":
    # Small DistilBERT-like config.
    VOCAB, MAX_POS = 128, 64
    HIDDEN, N_HEADS, FFN, N_LAYERS = 128, 4, 256, 2
    TOKENS_DIM = 5           # classifier dimension (num_labels)
    B, S = 2, 16

    root = jax.random.PRNGKey(0)
    k_param, k_ids = jax.random.split(root)

    params = init_params(k_param, VOCAB, MAX_POS, HIDDEN, FFN, N_LAYERS,
                         TOKENS_DIM)

    input_ids = jax.random.randint(k_ids, (B, S), 0, VOCAB, dtype=jnp.int32)
    # second sequence has 4 padding positions masked out
    lengths = jnp.array([[S], [S - 4]], dtype=jnp.int32)
    attention_mask = (jnp.arange(S)[None, :] < lengths).astype(jnp.int32)

    logits = distilbert_ner_forward(params, input_ids, attention_mask, N_HEADS,
                                    labels=None)
    logits = jax.block_until_ready(logits)

    assert logits.shape == (B, S, TOKENS_DIM), logits.shape
    assert bool(jnp.all(jnp.isfinite(logits)))
    print("KERNEL_OK")
</pallas_src>

<mosaic_0001>
module attributes {stable_mosaic.version = 11 : i64} {
  func.func @_ln_kernel(%arg0: i32, %arg1: memref<16x128xf32, #tpu.memory_space<vmem>>, %arg2: memref<1x128xf32, #tpu.memory_space<vmem>>, %arg3: memref<1x128xf32, #tpu.memory_space<vmem>>, %arg4: memref<16x128xbf16, #tpu.memory_space<vmem>>) attributes {dimension_semantics = [#tpu.dimension_semantics<parallel>], iteration_bounds = array<i64: 2>, scalar_prefetch = 0 : i64, scratch_operands = 0 : i64, tpu.core_type = #tpu.core_type<tc>, window_params = [{transform_indices = @transform_0, window_bounds = array<i64: 16, 128>}, {pipeline_mode = #tpu.pipeline_mode<synchronous>, transform_indices = @transform_1, window_bounds = array<i64: 1, 128>}, {pipeline_mode = #tpu.pipeline_mode<synchronous>, transform_indices = @transform_2, window_bounds = array<i64: 1, 128>}, {transform_indices = @transform_3, window_bounds = array<i64: 16, 128>}]} {
    %c0 = arith.constant 0 : index
    %c0_0 = arith.constant 0 : index
    %0 = vector.load %arg1[%c0, %c0_0] : memref<16x128xf32, #tpu.memory_space<vmem>>, vector<16x128xf32>
    %c0_1 = arith.constant 0 : index
    %c0_2 = arith.constant 0 : index
    %1 = vector.load %arg2[%c0_1, %c0_2] : memref<1x128xf32, #tpu.memory_space<vmem>>, vector<1x128xf32>
    %c0_3 = arith.constant 0 : index
    %c0_4 = arith.constant 0 : index
    %2 = vector.load %arg3[%c0_3, %c0_4] : memref<1x128xf32, #tpu.memory_space<vmem>>, vector<1x128xf32>
    %cst = arith.constant dense<0.000000e+00> : vector<16xf32>
    %3 = vector.multi_reduction <add>, %0, %cst [1] : vector<16x128xf32> to vector<16xf32>
    %4 = vector.shape_cast %3 : vector<16xf32> to vector<16x1xf32>
    %cst_5 = arith.constant 1.280000e+02 : f32
    %5 = vector.broadcast %cst_5 : f32 to vector<16x1xf32>
    %6 = arith.divf %4, %5 : vector<16x1xf32>
    %7 = vector.broadcast %6 : vector<16x1xf32> to vector<16x128xf32>
    %8 = arith.subf %0, %7 : vector<16x128xf32>
    %9 = vector.broadcast %6 : vector<16x1xf32> to vector<16x128xf32>
    %10 = arith.subf %0, %9 : vector<16x128xf32>
    %11 = arith.mulf %8, %10 : vector<16x128xf32>
    %cst_6 = arith.constant dense<0.000000e+00> : vector<16xf32>
    %12 = vector.multi_reduction <add>, %11, %cst_6 [1] : vector<16x128xf32> to vector<16xf32>
    %13 = vector.shape_cast %12 : vector<16xf32> to vector<16x1xf32>
    %cst_7 = arith.constant 1.280000e+02 : f32
    %14 = vector.broadcast %cst_7 : f32 to vector<16x1xf32>
    %15 = arith.divf %13, %14 : vector<16x1xf32>
    %16 = vector.broadcast %6 : vector<16x1xf32> to vector<16x128xf32>
    %17 = arith.subf %0, %16 : vector<16x128xf32>
    %cst_8 = arith.constant 9.99999996E-13 : f32
    %18 = vector.broadcast %cst_8 : f32 to vector<16x1xf32>
    %19 = arith.addf %15, %18 : vector<16x1xf32>
    %20 = math.rsqrt %19 : vector<16x1xf32>
    %21 = vector.broadcast %20 : vector<16x1xf32> to vector<16x128xf32>
    %22 = arith.mulf %17, %21 : vector<16x128xf32>
    %23 = vector.broadcast %1 : vector<1x128xf32> to vector<16x128xf32>
    %24 = arith.mulf %22, %23 : vector<16x128xf32>
    %25 = vector.broadcast %2 : vector<1x128xf32> to vector<16x128xf32>
    %26 = arith.addf %24, %25 : vector<16x128xf32>
    %27 = arith.truncf %26 : vector<16x128xf32> to vector<16x128xbf16>
    %c0_9 = arith.constant 0 : index
    %c0_10 = arith.constant 0 : index
    %28 = vector.load %arg4[%c0_9, %c0_10] : memref<16x128xbf16, #tpu.memory_space<vmem>>, vector<16x128xbf16>
    tpu.vector_store %arg4[%c0_9, %c0_10], %27 {strides = array<i32>} : memref<16x128xbf16, #tpu.memory_space<vmem>>, vector<16x128xbf16>,
    return
  }
  func.func @transform_0(%arg0: i32) -> (i32, i32) {
    %c0_i32 = arith.constant 0 : i32
    %c0_i32_0 = arith.constant 0 : i32
    return %arg0, %c0_i32 : i32, i32
  }
  func.func @transform_1(%arg0: i32) -> (i32, i32) {
    %c0_i32 = arith.constant 0 : i32
    %c0_i32_0 = arith.constant 0 : i32
    %c0_i32_1 = arith.constant 0 : i32
    return %c0_i32, %c0_i32_0 : i32, i32
  }
  func.func @transform_2(%arg0: i32) -> (i32, i32) {
    %c0_i32 = arith.constant 0 : i32
    %c0_i32_0 = arith.constant 0 : i32
    %c0_i32_1 = arith.constant 0 : i32
    return %c0_i32, %c0_i32_0 : i32, i32
  }
  func.func @transform_3(%arg0: i32) -> (i32, i32) {
    %c0_i32 = arith.constant 0 : i32
    %c0_i32_0 = arith.constant 0 : i32
    return %arg0, %c0_i32 : i32, i32
  }
}

</mosaic_0001>

<bundles_post_ra>
// kernel: tpu_custom_call.1
= control target key start
LH: loop header
LB: loop body
LE: loop exit
PB: predicated region body
PF: predicated region fallthrough
CT: control target
= control target key end

     0   :  { %8 = vsyncpa [#allocation3], 0  ;;  %s693_s0 = inlined_call_operand.hbm [shape: f32[32,128], index: 0, kind: input, shape index: {}]   ;;  %s694_s1 = inlined_call_operand.vmem [shape: f32[1,128], index: 1, kind: input, shape index: {}]   ;;  %s695_s2 = inlined_call_operand.vmem [shape: f32[1,128], index: 2, kind: input, shape index: {}]   ;;  %s696_s3 = inlined_call_operand.hbm [shape: bf16[32,128], index: 3, kind: output, shape index: {}]  }
   0x1   :  { %10 = vsyncpa [#allocation3 + $0x1], 0 }
   0x2   :  { %11 = vsyncpa [#allocation4], 0 }
   0x3   :  { %13 = vsyncpa [#allocation4 + $0x1], 0  ;;  %s532_s12 = smov 0   ;;  %s534_s13 = smov 0  }
   0x4   :  { %s536_s14 = smov 0   ;;  %s538_s15 = smov 0  }
   0x5 LB: > { %s553_s16 = sadd.s32 4294967295, %s504_s15   ;;  %s331_s17 = sadd.s32 4294967294, %s504_s15   ;;  %s504_s15 = sphi %s538_s15, %s711_s15   ;;  %s500_s14 = sphi %s536_s14, %s710_s14   ;;  %s496_s13 = sphi %s534_s13, %s709_s13   ;;  %s492_s12 = sphi %s532_s12, %s708_s12  }
   0x6   : > { %s557_s18 = sadd.s32 1, %s504_s15   ;;  %s26_s19 = sadd.s32 1, %s500_s14 }
   0x7   : > { %s23_s20 = ssub.s32 %s504_s15, %s557_s18  ;;  %p33_p0 = scmp.ne.s32.totalorder %s500_s14, %s496_s13 }
   0x8   : > { %p24_p1 = scmp.eq.s32.totalorder %s23_s20, 0  ;;  %p34_p2 = scmp.eq.s32.totalorder %s504_s15, 0 }
   0x9   : > { %p39_p3 = scmp.ne.s32.totalorder %s496_s13, %s492_s12  ;;  %p40_p4 = scmp.eq.s32.totalorder %s553_s16, 0 }
   0xa   : > { %s569_s21 = scalar_select %p24_p1, %s500_s14, %s26_s19  }
   0xb   : > { %p571_p5 = por %p34_p2, %p33_p0  ;;  %p575_p6 = por %p40_p4, %p39_p3 }
   0xc   : > { %p105_p7 = scmp.eq.s32.totalorder %s553_s16, 1  ;;  %p111_p8 = scmp.eq.s32.totalorder %s331_s17, 1 }
   0xd   : > { %s700_s23 = scalar_select %p575_p6, 1, 0 }
   0xe   : > { %p370_p10 = scmp.lt.s32.totalorder %s504_s15, 2  ;;  %p582_p11 = por %p105_p7, %p33_p0 }
   0xf   : > { %p586_p12 = por %p111_p8, %p39_p3  ;;  %s137_s26 = sand.u32 1, %s500_s14  }
  0x10   : > { %s701_s24 = scalar_select %p582_p11, 1, 0 }
  0x11   : > { %s702_s25 = scalar_select %p586_p12, 1, 0 }
  0x12   : > { %s349_s27 = sshll.u32 %s504_s15, 8  ;;  %s334_s28 = sshll.u32 %s137_s26, 4 }
  0x13   : > { %s595_s4 = scalar_lea.hbm %s693_s0, %s349_s27  ;;  %s141_s5 = scalar_lea.vmem [#allocation2], %s334_s28 }
  0x14   : > { %s148_s6 = sshll.u32 %s141_s5, 4  ;;  %p599_p13 = pnand %p370_p10, %p571_p5  ;;  %s603_s6 = int_to_ptr.vmem [resolvable:$true] %s148_s6 }
  0x15   : > { %s605_s8 = scalar_lea.sflag [#allocation3], %s137_s26  ;;  %s412_s9 = scalar_lea.hbm %s595_s4, 256 }
  0x16   : > { %p413_p0 = scmp.ne.s32.totalorder %s595_s4, %s412_s9  ;;  %p414_p1 = pneg %p599_p13 }
  0x17   : > { %s417_s17 = scalar_lea.hbm %s693_s0, 512  ;;  %p418_p4 = scmp.lt.s32.totalorder %s595_s4, %s693_s0 }
  0x18   : > { %p415_p2 = pnand %p414_p1, %p413_p0  ;;  %p419_p5 = scmp.lt.s32.totalorder %s417_s17, %s412_s9 }
  0x1a   : > { %p416_p3 = pneg %p415_p2  ;;  %p420_p7 = por %p419_p5, %p418_p4 }
  0x1c   : > { %p421_p8 = pnand %p420_p7, %p416_p3 }
  0x1e   : > { %424 = shalt.err (!%p421_p8)
}
  0x1f   : > { %s425_s22 = scalar_lea.vmem %s603_s6, 256  ;;  %s506_s26 = smov [#allocation2]  }
  0x20   : > { %p426_p10 = scmp.ne.s32.totalorder %s603_s6, %s425_s22  ;;  %s430_s27 = sshll.u32 %s506_s26, 4  ;;  %s431_s27 = int_to_ptr.vmem [resolvable:$false] %s430_s27 }
  0x21   : > { %s432_s28 = scalar_lea.vmem %s431_s27, 512  ;;  %p433_p2 = scmp.lt.s32.totalorder %s603_s6, %s431_s27 }
  0x22   : > { %p428_p9 = pnand %p426_p10, %p414_p1  ;;  %p434_p12 = scmp.lt.s32.totalorder %s432_s28, %s425_s22 }
  0x24   : > { %p429_p0 = pneg %p428_p9  ;;  %p435_p11 = por %p434_p12, %p433_p2 }
  0x26   : > { %p436_p6 = pnand %p435_p11, %p429_p0 }
  0x28   : > { %439 = shalt.err (!%p436_p6)
}
  0x29   : > { %s507_s29 = smov 128   ;;  %s508_s30 = smov 8  }
  0x2a   : > { %365 = dma.hbm_to_vmem [thread:$0]  (!%p599_p13), %s595_s4, 256, %s603_s6, %s605_s8, %s507_s29, %s507_s29, %s508_s30  }
  0x2b   : > { %p337_p9 = scmp.ge.s32.totalorder %s504_s15, 1  ;;  %p156_p1 = scmp.lt.s32.totalorder %s504_s15, 3 }
  0x2d   : > { %p157_p3 = pnand %p337_p9, %p156_p1 }
  0x2e   : > { %s629_s5 = sand.u32 (!%p157_p3), 1, %s496_s13   ;;  %p704_p6 = scmp.ne.s32.totalorder (!%p157_p3), %s700_s23, 0 }
  0x2f   : > { %160 = sbr.rel (%p157_p3) target bundleno = 380 (0x17c), region = 32  ;;  %s338_s9 = sshll.u32 (!%p157_p3), %s629_s5, 4 }
  0x30   : > { %s163_s10 = scalar_lea.sflag (!%p157_p3), [#allocation3], %s629_s5  ;;  %s166_s11 = scalar_lea.vmem (!%p157_p3), [#allocation2], %s338_s9 }
  0x34   : > { %483 = dma.done.wait (%p704_p6), %s163_s10, 256  }
  0x35   : > { %485 = vsyncadd (%p704_p6), %s163_s10, 4294967040  ;;  %v191_v0 = vld [vmem:[%s166_s11] sm:$0xff]  ;;  %v192_v1 = vld [vmem:[%s166_s11 + $0x8] sm:$0xff]  ;;  %s339_s23 = sshll.u32 %s629_s5, 3  ;;  %s352_s17 = sshll.u32 %s553_s16, 7 }
  0x36   : > { %195 = vadd.xlane.f32.xlu0 %v191_v0  ;;  %v340_v18 = vld [vmem:[%s694_s1] ss:$0 sm:$0xff]  ;;  %s188_s19 = scalar_lea.vmem [#allocation5], %s339_s23  ;;  %s648_s27 = scalar_lea.hbm %s696_s3, %s352_s17 }
  0x37   : > { %v341_v22 = vld [vmem:[%s695_s2] ss:$0 sm:$0xff]  ;;  %s258_s20 = sshll.u32 %s188_s19, 4  ;;  %s245_s28 = scalar_lea.sflag [#allocation4], %s629_s5  ;;  %s650_s20 = int_to_ptr.vmem [resolvable:$true] %s258_s20 }
  0x38   : > { %s440_s29 = scalar_lea.vmem %s650_s20, 128  ;;  %p705_p12 = scmp.ne.s32.totalorder %s701_s24, 0 }
  0x39   : > { %p441_p11 = scmp.ne.s32.totalorder %s650_s20, %s440_s29  ;;  %s509_s16 = smov [#allocation5]  }
  0x3a   : > { %197 = vadd.xlane.f32.xlu0 %v192_v1  ;;  %s444_s30 = sshll.u32 %s509_s16, 4  ;;  %s445_s30 = int_to_ptr.vmem [resolvable:$false] %s444_s30 }
  0x3b   : > { %p442_p13 = pnand %p441_p11, %p705_p12  ;;  %s446_s9 = scalar_lea.vmem %s445_s30, 256 }
  0x3c   : > { %p447_p5 = scmp.lt.s32.totalorder %s650_s20, %s445_s30  ;;  %p448_p7 = scmp.lt.s32.totalorder %s446_s9, %s440_s29 }
  0x3d   : > { %p443_p4 = pneg %p442_p13 }
  0x3e   : > { %p449_p8 = por %p448_p7, %p447_p5 }
  0x40   : > { %p450_p10 = pnand %p449_p8, %p443_p4 }
  0xbf   : > { %v196_v2 = vpop.xlane.xlu0 %195 }
  0xc0   : > { %v200_v3 = vmul.f32 0.0078125, %v196_v2 }
  0xc2   : > { %v202_v4 = vsub.f32 %v191_v0, %v200_v3 }
  0xc3   : > { %v198_v5 = vpop.xlane.xlu0 %197 }
  0xc4   : > { %v201_v6 = vmul.f32 0.0078125, %v198_v5  ;;  %v204_v7 = vmul.f32 %v202_v4, %v202_v4 }
  0xc6   : > { %v203_v8 = vsub.f32 %v192_v1, %v201_v6  ;;  %206 = vadd.xlane.f32.xlu1 %v204_v7 }
  0xc8   : > { %v205_v9 = vmul.f32 %v203_v8, %v203_v8 }
  0xca   : > { %208 = vadd.xlane.f32.xlu1 %v205_v9 }
 0x14f   : > { %v207_v10 = vpop.xlane.xlu1 %206 }
 0x150   : > { %v210_v11 = vmul.f32 0.0078125, %v207_v10 }
 0x152   : > { %v212_v12 = vadd.f32 1e-12, %v210_v11 }
 0x153   : > { %v209_v13 = vpop.xlane.xlu1 %208 }
 0x154   : > { %408 = vrsqrt.f32 %v212_v12  ;;  %v211_v14 = vmul.f32 0.0078125, %v209_v13 }
 0x156   : > { %v213_v15 = vadd.f32 1e-12, %v211_v14 }
 0x158   : > { %410 = vrsqrt.f32 %v213_v15 }
 0x161   : > { %v409_v16 = vpop.eup %408 }
 0x162   : > { %v216_v17 = vmul.f32 %v409_v16, %v202_v4 }
 0x164   : > { %v224_v20 = vmul.f32 %v340_v18, %v216_v17 }
 0x165   : > { %v411_v19 = vpop.eup %410 }
 0x166   : > { %v217_v21 = vmul.f32 %v411_v19, %v203_v8  ;;  %v232_v24 = vadd.f32 %v341_v22, %v224_v20 }
 0x168   : > { %v225_v23 = vmul.f32 %v340_v18, %v217_v21 }
 0x16a   : > { %v233_v25 = vadd.f32 %v341_v22, %v225_v23 }
 0x16c   : > { %v356_v26 = vpack.c.bf16 %v233_v25, %v232_v24 }
 0x16e   : > { %357 = vst [vmem:[%s188_s19] sm:$0xff] %v356_v26  }
 0x16f   : > { %453 = shalt.err (!%p450_p10)
}
 0x170   : > { %s454_s10 = scalar_lea.hbm %s648_s27, 128  ;;  %s458_s4 = scalar_lea.hbm %s696_s3, 256 }
 0x171   : > { %p455_p0 = scmp.ne.s32.totalorder %s648_s27, %s454_s10  ;;  %p459_p1 = scmp.lt.s32.totalorder %s648_s27, %s696_s3 }
 0x172   : > { %p460_p3 = scmp.lt.s32.totalorder %s458_s4, %s454_s10 }
 0x173   : > { %p456_p2 = pnand %p455_p0, %p705_p12 }
 0x174   : > { %p461_p6 = por %p460_p3, %p459_p1 }
 0x175   : > { %p457_p9 = pneg %p456_p2 }
 0x177   : > { %p462_p11 = pnand %p461_p6, %p457_p9 }
 0x179   : > { %465 = shalt.err (!%p462_p11)
}
 0x17a   : > { %s510_s8 = smov 64   ;;  %s511_s17 = smov 4  }
 0x17b   : > { %360 = dma.vmem_to_hbm [thread:$0]  (%p705_p12), %s650_s20, 128, %s648_s27, %s245_s28, %s510_s8, %s510_s8, %s511_s17  }
 0x17c PF: > { %s273_s19 = sand.u32 1, %s492_s12   ;;  %p706_p13 = scmp.ne.s32.totalorder %s702_s25, 0 }
 0x17d   : > { %p707_p4 = scmp.ge.s32.totalorder %s504_s15, 2  ;;  %s274_s22 = scalar_lea.sflag [#allocation4], %s273_s19 }
 0x17f   : > { %p367_p5 = pnand %p707_p4, %p706_p13 }
 0x181   : > { %p368_p7 = pneg %p367_p5 }
 0x183   : > { %487 = dma.done.wait (%p368_p7), %s274_s22, 128  }
 0x184   : > { %489 = vsyncadd (%p368_p7), %s274_s22, 4294967168  ;;  %p16_p8 = scmp.ge.s32.totalorder %s557_s18, 4   ;;  %s708_s12 = smov %s496_s13 }
 0x185   : > { %s709_s13 = smov %s500_s14  ;;  %s710_s14 = smov %s569_s21 }
 0x186   : > { %s711_s15 = smov %s557_s18  ;;  %18 = sbr.rel (!%p16_p8) target bundleno = 5 (0x5), region = 77 }
 0x18b   :  { %279 = vsyncpa [#allocation3], 1 }
 0x18c   :  { %281 = vsyncpa [#allocation3 + $0x1], 1 }
 0x18d   :  { %282 = vsyncpa [#allocation4], 1 }
 0x18e   :  { %284 = vsyncpa [#allocation4 + $0x1], 1 }

</bundles_post_ra>
